<compile_context>
chip_gen: v6e
topology: v6e:2x2x1
jax: 0.10.0
libtpu: 0.0.40
codegen_flags: <defaults>
</compile_context>

<pallas_src>
import functools

import jax
import jax.numpy as jnp
from jax import lax
from jax.experimental import pallas as pl
from jax.experimental.pallas import tpu as pltpu


def _round_up(x, m):
    return ((x + m - 1) // m) * m


def _bce_row_mean_kernel(*refs, inv_l, l_valid, tl, has_mask, mask_cols):
    """One (TB, TL) tile of stable BCE-with-logits, accumulated into o_ref.

    refs = (x_ref, t_ref, [m_ref,] o_ref)
    grid = (batch_tiles, l_tiles); the L (reduction) axis is last.
    """
    if has_mask:
        x_ref, t_ref, m_ref, o_ref = refs
    else:
        x_ref, t_ref, o_ref = refs
        m_ref = None

    j = pl.program_id(1)
    last_j = pl.num_programs(1) - 1

    @pl.when(j == 0)
    def _():
        o_ref[...] = jnp.zeros_like(o_ref)

    x = x_ref[...].astype(jnp.float32)
    t = t_ref[...].astype(jnp.float32)

    # Numerically-stable BCE-with-logits (same formulation PyTorch uses):
    #   l = max(x, 0) - x*t + log(1 + exp(-|x|))
    loss = jnp.maximum(x, 0.0) - x * t + jnp.log1p(jnp.exp(-jnp.abs(x)))

    if m_ref is not None:
        loss = loss * m_ref[...].astype(jnp.float32)

    if mask_cols:
        # Only the last reduction tile extends past L; keep the iota/compare/
        # select off the other tiles entirely (pure VALU savings).
        @pl.when(j < last_j)
        def _():
            o_ref[...] += jnp.sum(loss, axis=1, keepdims=True)

        @pl.when(j == last_j)
        def _():
            limit = l_valid - j * tl
            col = lax.broadcasted_iota(jnp.int32, loss.shape, 1)
            masked = jnp.where(col < limit, loss, 0.0)
            o_ref[...] = (o_ref[...] + jnp.sum(masked, axis=1, keepdims=True)) * inv_l
    else:
        o_ref[...] += jnp.sum(loss, axis=1, keepdims=True)

        @pl.when(j == last_j)
        def _():
            # reduction='none' then .mean(dim=1): divide by the ORIGINAL L.
            o_ref[...] = o_ref[...] * inv_l


def sigmoid_bce_loss(inputs, target, mask=None, *, tb_max=256, tl_max=8192,
                     stream_bf16=False):
    """Pallas implementation of SigmoidBCELoss.forward.

    inputs, target, mask: (B, L) arrays (any float dtype; mask may be None).
    Returns: (B,) float32 mean-over-dim-1 (masked) BCE-with-logits loss.
    """
    assert inputs.shape == target.shape, (inputs.shape, target.shape)
    B, L = inputs.shape
    has_mask = mask is not None
    if has_mask:
        assert mask.shape == (B, L), mask.shape

    operands = [inputs, target] + ([mask] if has_mask else [])
    if stream_bf16:
        # Opt-in: halve HBM bytes for f32 callers; f32 math stays in-kernel.
        operands = [op.astype(jnp.bfloat16) for op in operands]

    # --- tile selection: no wrapper padding, partial edge blocks instead ----
    tb_max = max(8, (tb_max // 8) * 8)
    tl_max = max(128, (tl_max // 128) * 128)

    if B <= 8:
        TB = B                      # full dim (allowed when block == array dim)
    else:
        # >= 2 batch tiles so the "parallel" axis shards across both v7x TCs;
        # 8-aligned near-equal split keeps edge waste within one sublane group.
        TB = min(tb_max, _round_up(pl.cdiv(B, 2), 8))

    n_streams = len(operands)
    itemsize = max(jnp.dtype(op.dtype).itemsize for op in operands)
    # ~32 MiB budget for the double-buffered input streams (v7x-safe).
    vmem_budget = 32 * 1024 * 1024
    bytes_per_col = 2 * n_streams * TB * itemsize
    tl_cap = max(128, (vmem_budget // bytes_per_col) // 128 * 128)
    if L <= 128:
        TL = L                      # full dim
    else:
        TL = min(_round_up(L, 128), tl_cap, tl_max)

    grid = (pl.cdiv(B, TB), pl.cdiv(L, TL))
    mask_cols = (L % TL) != 0       # last reduction tile has padded columns

    in_specs = [pl.BlockSpec((TB, TL), lambda i, j: (i, j)) for _ in operands]
    out_spec = pl.BlockSpec((TB, 1), lambda i, j: (i, 0))

    kernel = functools.partial(
        _bce_row_mean_kernel,
        inv_l=float(1.0 / L),
        l_valid=L,
        tl=TL,
        has_mask=has_mask,
        mask_cols=mask_cols,
    )

    out = pl.pallas_call(
        kernel,
        out_shape=jax.ShapeDtypeStruct((B, 1), jnp.float32),
        grid=grid,
        in_specs=in_specs,
        out_specs=out_spec,
        compiler_params=pltpu.CompilerParams(
            dimension_semantics=("parallel", "arbitrary"),
            vmem_limit_bytes=48 * 1024 * 1024,
        ),
    )(*operands)

    return out[:, 0]


def _reference(inputs, target, mask=None):
    x = inputs.astype(jnp.float32)
    t = target.astype(jnp.float32)
    loss = jnp.maximum(x, 0.0) - x * t + jnp.log1p(jnp.exp(-jnp.abs(x)))
    if mask is not None:
        loss = loss * mask.astype(jnp.float32)
    return jnp.mean(loss, axis=1)


if __name__ == "__main__":
    key = jax.random.PRNGKey(0)

    # --- test 1: small word2vec-like shape, masked + unmasked ---------------
    B, L = 4, 64
    k1, k2, k3, key = jax.random.split(key, 4)
    inputs = jax.random.normal(k1, (B, L), dtype=jnp.float32) * 3.0
    target = (jax.random.uniform(k2, (B, L)) > 0.5).astype(jnp.float32)
    mask = (jax.random.uniform(k3, (B, L)) > 0.25).astype(jnp.float32)

    out = sigmoid_bce_loss(inputs, target, mask)
    jax.block_until_ready(out)
    assert out.shape == (B,)
    assert jnp.allclose(out, _reference(inputs, target, mask), atol=1e-5, rtol=1e-5)

    out_nm = sigmoid_bce_loss(inputs, target)  # no-mask variant (2 streams only)
    jax.block_until_ready(out_nm)
    assert jnp.allclose(out_nm, _reference(inputs, target), atol=1e-5, rtol=1e-5)

    # --- test 2: multi-tile grid with partial edge blocks (no wrapper pad) --
    B2, L2 = 24, 300
    k1, k2, k3, key = jax.random.split(key, 4)
    x2 = jax.random.normal(k1, (B2, L2), dtype=jnp.float32) * 2.0
    t2 = (jax.random.uniform(k2, (B2, L2)) > 0.5).astype(jnp.float32)
    m2 = (jax.random.uniform(k3, (B2, L2)) > 0.25).astype(jnp.float32)

    out2 = sigmoid_bce_loss(x2, t2, m2, tb_max=8, tl_max=128)
    jax.block_until_ready(out2)
    assert jnp.allclose(out2, _reference(x2, t2, m2), atol=1e-5, rtol=1e-5)

    # --- test 3: ragged B (partial batch block) + ragged L, unmasked --------
    B3, L3 = 13, 200
    k1, k2, key = jax.random.split(key, 3)
    x3 = jax.random.normal(k1, (B3, L3), dtype=jnp.float32) * 2.0
    t3 = (jax.random.uniform(k2, (B3, L3)) > 0.5).astype(jnp.float32)
    out3 = sigmoid_bce_loss(x3, t3)
    jax.block_until_ready(out3)
    assert jnp.allclose(out3, _reference(x3, t3), atol=1e-5, rtol=1e-5)

    # --- test 4: native bf16 inputs (exact vs same-valued reference) --------
    x4 = x2.astype(jnp.bfloat16)
    t4 = t2.astype(jnp.bfloat16)
    m4 = m2.astype(jnp.bfloat16)
    out4 = sigmoid_bce_loss(x4, t4, m4)
    jax.block_until_ready(out4)
    assert jnp.allclose(out4, _reference(x4, t4, m4), atol=1e-5, rtol=1e-5)

    # --- test 5: opt-in bf16 streaming of f32 operands (looser tolerance) ---
    out5 = sigmoid_bce_loss(x2, t2, m2, stream_bf16=True)
    jax.block_until_ready(out5)
    assert jnp.allclose(out5, _reference(x2, t2, m2), atol=2e-2, rtol=2e-2)

    print("KERNEL_OK")
</pallas_src>

<mosaic_0001>
module attributes {stable_mosaic.version = 11 : i64} {
  func.func @_bce_row_mean_kernel(%arg0: i32, %arg1: i32, %arg2: memref<4x64xf32, #tpu.memory_space<vmem>>, %arg3: memref<4x64xf32, #tpu.memory_space<vmem>>, %arg4: memref<4x64xf32, #tpu.memory_space<vmem>>, %arg5: memref<4x1xf32, #tpu.memory_space<vmem>>) attributes {dimension_semantics = [#tpu.dimension_semantics<parallel>, #tpu.dimension_semantics<arbitrary>], iteration_bounds = array<i64: 1, 1>, scalar_prefetch = 0 : i64, scratch_operands = 0 : i64, tpu.core_type = #tpu.core_type<tc>, window_params = [{transform_indices = @transform_0, window_bounds = array<i64: 4, 64>}, {transform_indices = @transform_1, window_bounds = array<i64: 4, 64>}, {transform_indices = @transform_2, window_bounds = array<i64: 4, 64>}, {transform_indices = @transform_3, window_bounds = array<i64: 4, 1>}]} {
    %c0_i32 = arith.constant 0 : i32
    %0 = arith.cmpi eq, %arg1, %c0_i32 : i32
    %1 = arith.extui %0 : i1 to i32
    %c0_i32_0 = arith.constant 0 : i32
    %2 = arith.cmpi ne, %1, %c0_i32_0 : i32
    scf.if %2 {
      %cst_14 = arith.constant 0.000000e+00 : f32
      %25 = vector.broadcast %cst_14 : f32 to vector<4x1xf32>
      %c0_15 = arith.constant 0 : index
      %c0_16 = arith.constant 0 : index
      %26 = vector.load %arg5[%c0_15, %c0_16] : memref<4x1xf32, #tpu.memory_space<vmem>>, vector<4x1xf32>
      tpu.vector_store %arg5[%c0_15, %c0_16], %25 {strides = array<i32>} : memref<4x1xf32, #tpu.memory_space<vmem>>, vector<4x1xf32>,
    } else {
    }
    %c0 = arith.constant 0 : index
    %c0_1 = arith.constant 0 : index
    %3 = vector.load %arg2[%c0, %c0_1] : memref<4x64xf32, #tpu.memory_space<vmem>>, vector<4x64xf32>
    %c0_2 = arith.constant 0 : index
    %c0_3 = arith.constant 0 : index
    %4 = vector.load %arg3[%c0_2, %c0_3] : memref<4x64xf32, #tpu.memory_space<vmem>>, vector<4x64xf32>
    %cst = arith.constant 0.000000e+00 : f32
    %5 = vector.broadcast %cst : f32 to vector<4x64xf32>
    %6 = arith.maximumf %3, %5 : vector<4x64xf32>
    %7 = arith.mulf %3, %4 : vector<4x64xf32>
    %8 = arith.subf %6, %7 : vector<4x64xf32>
    %9 = math.absf %3 : vector<4x64xf32>
    %cst_4 = arith.constant 0.000000e+00 : f32
    %10 = vector.broadcast %cst_4 : f32 to vector<4x64xf32>
    %11 = arith.subf %10, %9 : vector<4x64xf32>
    %12 = math.exp %11 : vector<4x64xf32>
    %13 = math.log1p %12 : vector<4x64xf32>
    %14 = arith.addf %8, %13 : vector<4x64xf32>
    %c0_5 = arith.constant 0 : index
    %c0_6 = arith.constant 0 : index
    %15 = vector.load %arg4[%c0_5, %c0_6] : memref<4x64xf32, #tpu.memory_space<vmem>>, vector<4x64xf32>
    %16 = arith.mulf %14, %15 : vector<4x64xf32>
    %c0_7 = arith.constant 0 : index
    %c0_8 = arith.constant 0 : index
    %17 = vector.load %arg5[%c0_7, %c0_8] : memref<4x1xf32, #tpu.memory_space<vmem>>, vector<4x1xf32>
    %cst_9 = arith.constant dense<0.000000e+00> : vector<4xf32>
    %18 = vector.multi_reduction <add>, %16, %cst_9 [1] : vector<4x64xf32> to vector<4xf32>
    %19 = vector.shape_cast %18 : vector<4xf32> to vector<4x1xf32>
    %20 = arith.addf %17, %19 : vector<4x1xf32>
    %c0_10 = arith.constant 0 : index
    %c0_11 = arith.constant 0 : index
    %21 = vector.load %arg5[%c0_10, %c0_11] : memref<4x1xf32, #tpu.memory_space<vmem>>, vector<4x1xf32>
    tpu.vector_store %arg5[%c0_10, %c0_11], %20 {strides = array<i32>} : memref<4x1xf32, #tpu.memory_space<vmem>>, vector<4x1xf32>,
    %c0_i32_12 = arith.constant 0 : i32
    %22 = arith.cmpi eq, %arg1, %c0_i32_12 : i32
    %23 = arith.extui %22 : i1 to i32
    %c0_i32_13 = arith.constant 0 : i32
    %24 = arith.cmpi ne, %23, %c0_i32_13 : i32
    scf.if %24 {
      %c0_14 = arith.constant 0 : index
      %c0_15 = arith.constant 0 : index
      %25 = vector.load %arg5[%c0_14, %c0_15] : memref<4x1xf32, #tpu.memory_space<vmem>>, vector<4x1xf32>
      %cst_16 = arith.constant 1.562500e-02 : f32
      %26 = vector.broadcast %cst_16 : f32 to vector<4x1xf32>
      %27 = arith.mulf %25, %26 : vector<4x1xf32>
      %c0_17 = arith.constant 0 : index
      %c0_18 = arith.constant 0 : index
      %28 = vector.load %arg5[%c0_17, %c0_18] : memref<4x1xf32, #tpu.memory_space<vmem>>, vector<4x1xf32>
      tpu.vector_store %arg5[%c0_17, %c0_18], %27 {strides = array<i32>} : memref<4x1xf32, #tpu.memory_space<vmem>>, vector<4x1xf32>,
    } else {
    }
    return
  }
  func.func @transform_0(%arg0: i32, %arg1: i32) -> (i32, i32) {
    %c0_i32 = arith.constant 0 : i32
    return %arg0, %arg1 : i32, i32
  }
  func.func @transform_1(%arg0: i32, %arg1: i32) -> (i32, i32) {
    %c0_i32 = arith.constant 0 : i32
    return %arg0, %arg1 : i32, i32
  }
  func.func @transform_2(%arg0: i32, %arg1: i32) -> (i32, i32) {
    %c0_i32 = arith.constant 0 : i32
    return %arg0, %arg1 : i32, i32
  }
  func.func @transform_3(%arg0: i32, %arg1: i32) -> (i32, i32) {
    %c0_i32 = arith.constant 0 : i32
    %c0_i32_0 = arith.constant 0 : i32
    return %arg0, %c0_i32 : i32, i32
  }
}

</mosaic_0001>

<bundles_post_ra>
// kernel: tpu_custom_call.1
= control target key start
LH: loop header
LB: loop body
LE: loop exit
PB: predicated region body
PF: predicated region fallthrough
CT: control target
= control target key end

     0   :  { %8 = vsyncpa [#allocation3], 0  ;;  %s219_s0 = inlined_call_operand.hbm [shape: f32[4,64], index: 0, kind: input, shape index: {}]   ;;  %s220_s1 = inlined_call_operand.hbm [shape: f32[4,64], index: 1, kind: input, shape index: {}]   ;;  %s221_s2 = inlined_call_operand.hbm [shape: f32[4,64], index: 2, kind: input, shape index: {}]   ;;  %s222_s3 = inlined_call_operand.vmem [shape: f32[4,1], index: 3, kind: output, shape index: {}]  }
   0x1   :  { %9 = vsyncpa [#allocation5], 0  ;;  %s168_s12 = smov [#allocation4]   ;;  %s169_s14 = smov [#allocation2]  }
   0x2   :  { %s26_s13 = sshll.u32 %s168_s12, 4  ;;  %s16_s15 = sshll.u32 %s169_s14, 4  ;;  %s27_s13 = int_to_ptr.vmem [resolvable:$true] %s26_s13  ;;  %s17_s15 = int_to_ptr.vmem [resolvable:$true] %s16_s15 }
   0x3   :  { %s112_s16 = scalar_lea.vmem %s27_s13, 64  ;;  %p117_p1 = scmp.lt.s32.totalorder %s27_s13, %s27_s13 }
   0x4   :  { %p113_p0 = scmp.ne.s32.totalorder %s27_s13, %s112_s16  ;;  %p118_p2 = scmp.lt.s32.totalorder %s112_s16, %s112_s16 }
   0x6   :  { %p119_p3 = por %p118_p2, %p117_p1 }
   0x8   :  { %p120_p4 = pnand %p119_p3, %p113_p0 }
   0xa   :  { %123 = shalt.err (!%p120_p4)
}
   0xb   :  { %29 = dma.hbm_to_vmem [thread:$0]  %s220_s1, 64, %s27_s13, [#allocation5]  }
   0xc   :  { %s132_s19 = scalar_lea.vmem %s17_s15, 64  ;;  %p137_p6 = scmp.lt.s32.totalorder %s17_s15, %s17_s15 }
   0xd   :  { %p133_p5 = scmp.ne.s32.totalorder %s17_s15, %s132_s19  ;;  %p138_p7 = scmp.lt.s32.totalorder %s132_s19, %s132_s19 }
   0xf   :  { %p139_p8 = por %p138_p7, %p137_p6 }
  0x11   :  { %p140_p9 = pnand %p139_p8, %p133_p5 }
  0x13   :  { %143 = shalt.err (!%p140_p9)
}
  0x14   :  { %19 = dma.hbm_to_vmem [thread:$0]  %s219_s0, 64, %s17_s15, [#allocation3]  }
  0x15   :  { %s170_s22 = smov [#allocation6]  }
  0x16   :  { %s36_s23 = sshll.u32 %s170_s22, 4  ;;  %s37_s23 = int_to_ptr.vmem [resolvable:$true] %s36_s23 }
  0x17   :  { %s152_s24 = scalar_lea.vmem %s37_s23, 64  ;;  %p157_p11 = scmp.lt.s32.totalorder %s37_s23, %s37_s23 }
  0x18   :  { %p153_p10 = scmp.ne.s32.totalorder %s37_s23, %s152_s24  ;;  %p158_p12 = scmp.lt.s32.totalorder %s152_s24, %s152_s24 }
  0x1a   :  { %p159_p13 = por %p158_p12, %p157_p11 }
  0x1c   :  { %p160_p0 = pnand %p159_p13, %p153_p10 }
  0x1e   :  { %163 = shalt.err (!%p160_p0)
}
  0x1f   :  { %39 = dma.hbm_to_vmem [thread:$0]  %s221_s2, 64, %s37_s23, [#allocation5]  }
  0x20   :  { %164 = dma.done.wait [#allocation3], 64  }
  0x21   :  { %165 = vsyncadd [#allocation3], 4294967232 }
  0x22   :  { %166 = dma.done.wait [#allocation5], 128  }
  0x23   :  { %167 = vsyncadd [#allocation5], 4294967168  ;;  %vm53_vm0 = vcmask 3072   ;;  %v171_v0 = vmov 0.0   ;;  %v55_v1 = vld [vmem:[#allocation2] sm:$0xf] }
  0x24   :  { %54 = vst.msk [vmem:[%s222_s3] sm:$0xf] %vm53_vm0, %v171_v0  ;;  %v60_v2 = vand.u32 2147483647, %v55_v1  ;;  %v56_v8 = vld [vmem:[#allocation4] sm:$0xf] }
  0x25   :  { %v57_v10 = vmax.f32 %v55_v1, 0.0  ;;  %v58_v11 = vmul.f32 %v56_v8, %v55_v1  ;;  %v74_v18 = vld [vmem:[#allocation6] sm:$0xf]  ;;  %vm77_vm2 = vcmask 519168  }
  0x26   :  { %v61_v3 = vsub.f32 0.0, %v60_v2 }
  0x27   :  { %v59_v15 = vsub.f32 %v57_v10, %v58_v11 }
  0x28   :  { %v62_v4 = vmul.f32 1.442695, %v61_v3 }
  0x2a   :  { %100 = vpow2.f32 %v62_v4 }
  0x2b   :  { %v76_v22 = vld [vmem:[%s222_s3] sm:$0xf] }
  0x37   :  { %v101_v5 = vpop.eup %100 }
  0x38   :  { %v64_v6 = vadd.f32 1.0, %v101_v5  ;;  %v67_v7 = vmul.f32 -0.5, %v101_v5  ;;  %v70_v12 = vand.u32 2147483647, %v101_v5 }
  0x3a   :  { %102 = vlog2.f32 %v64_v6  ;;  %v68_v9 = vadd.f32 1.0, %v67_v7  ;;  %vm71_vm1 = vcmp.lt.f32.partialorder %v70_v12, 0.0004427343 }
  0x3c   :  { %v69_v13 = vmul.f32 %v101_v5, %v68_v9 }
  0x47   :  { %v103_v14 = vpop.eup %102 }
  0x48   :  { %v66_v16 = vmul.f32 0.6931472, %v103_v14 }
  0x4a   :  { %v72_v17 = vsel %vm71_vm1, %v69_v13, %v66_v16 }
  0x4b   :  { %v73_v19 = vadd.f32 %v72_v17, %v59_v15 }
  0x4d   :  { %v75_v20 = vmul.f32 %v74_v18, %v73_v19 }
  0x4f   :  { %v78_v21 = vsel %vm77_vm2, %v75_v20, 0.0 }
  0x50   :  { %79 = vadd.xlane.f32.xlu0 %v78_v21 }
  0xd9   :  { %v80_v23 = vpop.xlane.xlu0 %79 }
  0xda   :  { %v81_v24 = vadd.f32 %v80_v23, %v76_v22 }
  0xdc   :  { %83 = vst.msk [vmem:[%s222_s3] sm:$0xf] %vm53_vm0, %v81_v24 }
  0xe3   :  { %v87_v25 = vld [vmem:[%s222_s3] sm:$0xf] }
  0xe4   :  { %v88_v26 = vmul.f32 0.015625, %v87_v25 }
  0xe6   :  { %89 = vst.msk [vmem:[%s222_s3] sm:$0xf] %vm53_vm0, %v88_v26 }
  0xe7   :  { %94 = vsyncpa [#allocation3], 1 }
  0xe8   :  { %95 = vsyncpa [#allocation5], 1 }

</bundles_post_ra>
